<compile_context>
chip_gen: v7x
topology: tpu7x:2x2x1
jax: 0.10.0
libtpu: 0.0.40
codegen_flags: <defaults>
</compile_context>

<pallas_src>
import jax
import jax.numpy as jnp
from jax.experimental import pallas as pl
from jax.experimental.pallas import tpu as pltpu


# ----------------------------------------------------------------------------
# helpers
# ----------------------------------------------------------------------------
def _round_up(x: int, m: int) -> int:
    return ((x + m - 1) // m) * m


def _pick_tile(dim: int, granule: int, max_tile: int) -> int:
    """Largest t with t % granule == 0, t | dim, t <= max_tile.  dim % granule == 0."""
    q = dim // granule
    max_units = max(1, min(max_tile, dim) // granule)
    for units in range(min(max_units, q), 0, -1):
        if q % units == 0:
            return units * granule
    return granule


def _vmem_capacity_bytes() -> int:
    try:
        return int(pltpu.get_tpu_info().vmem_capacity_bytes)
    except Exception:
        return 64 << 20  # conservative: v7x per-TensorCore VMEM


# ----------------------------------------------------------------------------
# kernels
# ----------------------------------------------------------------------------
def _linear_kernel_accum_out(x_ref, w_ref, b_ref, o_ref):
    """f32 output: accumulate directly into the resident output block.

    Saves the (tm, tn) f32 scratch and the finalize copy (one vst per element)
    — the slot that binds on v5e after the MXU.
    """
    k = pl.program_id(2)

    @pl.when(k == 0)
    def _init():
        # Fold the bias into the accumulator init (free vs. zeros-init).
        o_ref[...] = jnp.broadcast_to(b_ref[...], o_ref.shape)

    o_ref[...] += jnp.dot(x_ref[...], w_ref[...], preferred_element_type=jnp.float32)


def _linear_kernel_scratch(x_ref, w_ref, b_ref, o_ref, acc_ref):
    """Non-f32 output: f32 VMEM accumulator, single cast+store on the last k."""
    k = pl.program_id(2)

    @pl.when(k == 0)
    def _init():
        acc_ref[...] = jnp.broadcast_to(b_ref[...], acc_ref.shape)

    acc_ref[...] += jnp.dot(x_ref[...], w_ref[...], preferred_element_type=jnp.float32)

    @pl.when(k == pl.num_programs(2) - 1)
    def _finalize():
        o_ref[...] = acc_ref[...].astype(o_ref.dtype)


# ----------------------------------------------------------------------------
# parameter preparation (one-time, NOT per forward call)
# ----------------------------------------------------------------------------
def prepare_linear_params(weight, bias, *, compute_dtype=jnp.bfloat16):
    """One-time layout fix-up:
       - transpose PyTorch (out, in) weight -> (in, out)
       - cast to the MXU compute dtype (default bf16; accumulation stays f32)
       - zero-pad K (=in_size) and N (=out_size) to the 128-lane boundary only
         (tile sizes are later chosen as divisors of these padded dims, so no
         systematic over-padding to the tile size).
    """
    out_size, in_size = weight.shape
    cdtype = jnp.dtype(compute_dtype)

    kp = _round_up(in_size, 128)
    np_ = _round_up(out_size, 128)

    w_t = (
        jnp.zeros((kp, np_), cdtype)
        .at[:in_size, :out_size]
        .set(weight.T.astype(cdtype))
    )
    b2d = jnp.zeros((1, np_), jnp.float32).at[0, :out_size].set(bias.astype(jnp.float32))

    return {
        "w": w_t,            # (Kp, Np): pre-transposed, 128-padded, compute dtype
        "b": b2d,            # (1, Np): f32 (accumulation dtype)
        "in_size": in_size,
        "out_size": out_size,
    }


# ----------------------------------------------------------------------------
# forward
# ----------------------------------------------------------------------------
def linear_nn_forward(x, params, *, max_tm=512, max_tn=512, max_tk=None,
                      use_pallas=None):
    """x: (..., in_size) -> (..., out_size).  Tiled Pallas matmul + bias."""
    in_size = params["in_size"]
    out_size = params["out_size"]
    w, b = params["w"], params["b"]
    kp, np_ = w.shape
    cdtype = w.dtype
    out_dtype = x.dtype

    lead = x.shape[:-1]
    x2 = x.reshape(-1, in_size)
    m = x2.shape[0]

    # --- tiny-problem dispatch: a single-layer Pallas call cannot beat XLA
    #     when the padded work is dominated by the ~0.35 us/step fixed cost.
    if use_pallas is None:
        use_pallas = (m * kp * np_) >= (1 << 21)
    if not use_pallas:
        out = jnp.dot(x2.astype(cdtype), w[:in_size, :out_size],
                      preferred_element_type=jnp.float32) + b[0, :out_size]
        return out.astype(out_dtype).reshape(*lead, out_size)

    xb = jnp.dtype(cdtype).itemsize
    ob = jnp.dtype(out_dtype).itemsize
    sublane = 8 if xb >= 4 else 16
    if max_tk is None:
        max_tk = 2048 if xb <= 2 else 1024

    # ----- tile selection ---------------------------------------------------
    # M: avoid a padding copy of x whenever possible.
    if m <= max_tm:
        tm, mp = m, m                       # full-dim block, no M padding
    else:
        mp0 = _round_up(m, sublane)
        tm = _pick_tile(mp0, sublane, max_tm)
        if tm >= min(max_tm, 256):
            mp = mp0                        # clean divisor, only sublane pad
        else:                               # ragged M: pad to a clean tile multiple
            tm = _round_up(min(max_tm, 512), sublane)
            mp = _round_up(m, tm)

    tn = _pick_tile(np_, 128, max_tn)
    tk = _pick_tile(kp, 128, max_tk)

    # Guarantee >=2 parallel (M x N) output tiles when possible so both v7x
    # TensorCores get work (dimension_semantics shards the parallel axes).
    if (mp // tm) * (np_ // tn) < 2:
        if np_ // tn < 2 and np_ >= 256:
            tn = _pick_tile(np_, 128, np_ // 2)
        elif mp // tm < 2 and mp % (2 * sublane) == 0:
            tm = _pick_tile(mp, sublane, mp // 2)

    # ----- generation-aware VMEM budget --------------------------------------
    needs_scratch = out_dtype != jnp.float32
    vmem_cap = _vmem_capacity_bytes()             # 64 MiB v7x, 128 MiB v5e/v6e
    vmem_budget = (vmem_cap * 3) // 4             # 48 / 96 MiB

    def tile_bytes(tm_, tn_, tk_):
        return (2 * (tm_ * tk_ + tk_ * tn_) * xb      # double-buffered x, w
                + 2 * tm_ * tn_ * ob                  # double-buffered out
                + 2 * tn_ * 4                         # bias block
                + (tm_ * tn_ * 4 if needs_scratch else 0))

    while tile_bytes(tm, tn, tk) > vmem_budget:
        if tk > 128:
            tk = _pick_tile(kp, 128, tk // 2)
        elif tn > 128:
            tn = _pick_tile(np_, 128, tn // 2)
        elif tm > sublane and mp % sublane == 0 and tm > 8:
            tm = _pick_tile(mp, sublane, max(tm // 2, sublane))
        else:
            break

    # ----- pad / cast x only when actually needed ----------------------------
    if mp != m or kp != in_size:
        xp = jnp.zeros((mp, kp), cdtype).at[:m, :in_size].set(x2.astype(cdtype))
    else:
        xp = x2.astype(cdtype)

    gm, gn, gk = mp // tm, np_ // tn, kp // tk
    grid = (gm, gn, gk)

    vmem_limit = int(min(max(int(1.5 * tile_bytes(tm, tn, tk)), 8 << 20), vmem_budget))

    # Cost estimate on padded shapes with tile re-reads (x read gn times, w gm times).
    cost = pl.CostEstimate(
        flops=2 * mp * kp * np_,
        transcendentals=0,
        bytes_accessed=(mp * kp * xb * gn
                        + kp * np_ * xb * gm
                        + np_ * 4 * gm
                        + mp * np_ * ob),
    )

    in_specs = [
        pl.BlockSpec((tm, tk), lambda i, j, k: (i, k)),   # x tile
        pl.BlockSpec((tk, tn), lambda i, j, k: (k, j)),   # w tile (pre-transposed)
        pl.BlockSpec((1, tn), lambda i, j, k: (0, j)),    # bias tile
    ]
    out_specs = pl.BlockSpec((tm, tn), lambda i, j, k: (i, j))
    cparams = pltpu.CompilerParams(
        dimension_semantics=("parallel", "parallel", "arbitrary"),
        vmem_limit_bytes=vmem_limit,
    )

    if needs_scratch:
        out_p = pl.pallas_call(
            _linear_kernel_scratch,
            out_shape=jax.ShapeDtypeStruct((mp, np_), out_dtype),
            grid=grid,
            in_specs=in_specs,
            out_specs=out_specs,
            scratch_shapes=[pltpu.VMEM((tm, tn), jnp.float32)],
            compiler_params=cparams,
            cost_estimate=cost,
        )(xp, w, b)
    else:
        out_p = pl.pallas_call(
            _linear_kernel_accum_out,
            out_shape=jax.ShapeDtypeStruct((mp, np_), out_dtype),
            grid=grid,
            in_specs=in_specs,
            out_specs=out_specs,
            compiler_params=cparams,
            cost_estimate=cost,
        )(xp, w, b)

    out = out_p[:m, :out_size]
    return out.reshape(*lead, out_size)


# ----------------------------------------------------------------------------
# PyTorch-equivalent init
# ----------------------------------------------------------------------------
def init_linear_params(key, in_size, out_size, dtype=jnp.float32):
    # nn.Linear default init: U(-1/sqrt(in), 1/sqrt(in)) for W and b.
    kw, kb = jax.random.split(key)
    bound = 1.0 / (in_size ** 0.5)
    weight = jax.random.uniform(kw, (out_size, in_size), dtype, -bound, bound)
    bias = jax.random.uniform(kb, (out_size,), dtype, -bound, bound)
    return weight, bias


if __name__ == "__main__":
    key = jax.random.PRNGKey(0)
    k_x, k_p = jax.random.split(key)

    batch, in_size, out_size = 8, 32, 16
    x = jax.random.normal(k_x, (batch, in_size), jnp.float32)
    weight, bias = init_linear_params(k_p, in_size, out_size)

    # One-time layout / padding / bf16 cast (no per-call weight.T).
    params = prepare_linear_params(weight, bias)   # compute_dtype=bf16 default

    # Force the Pallas path so the kernel is exercised even at demo sizes
    # (auto-dispatch would route this tiny layer to plain XLA).
    out = jax.block_until_ready(linear_nn_forward(x, params, use_pallas=True))

    # Reference (f32).  Kernel computes in bf16 with f32 accumulation, so use
    # a bf16-appropriate tolerance.
    ref = x @ weight.T + bias
    assert out.shape == (batch, out_size)
    assert jnp.allclose(out, ref, atol=2e-2, rtol=2e-2)

    print("KERNEL_OK")
</pallas_src>

<mosaic_0001>
module attributes {stable_mosaic.version = 11 : i64} {
  func.func @_linear_kernel_accum_out(%arg0: i32, %arg1: i32, %arg2: i32, %arg3: memref<8x128xbf16, #tpu.memory_space<vmem>>, %arg4: memref<128x128xbf16, #tpu.memory_space<vmem>>, %arg5: memref<1x128xf32, #tpu.memory_space<vmem>>, %arg6: memref<8x128xf32, #tpu.memory_space<vmem>>) attributes {dimension_semantics = [#tpu.dimension_semantics<parallel>, #tpu.dimension_semantics<parallel>, #tpu.dimension_semantics<arbitrary>], iteration_bounds = array<i64: 1, 1, 1>, scalar_prefetch = 0 : i64, scratch_operands = 0 : i64, tpu.core_type = #tpu.core_type<tc>, window_params = [{transform_indices = @transform_0, window_bounds = array<i64: 8, 128>}, {transform_indices = @transform_1, window_bounds = array<i64: 128, 128>}, {transform_indices = @transform_2, window_bounds = array<i64: 1, 128>}, {transform_indices = @transform_3, window_bounds = array<i64: 8, 128>}]} {
    %c0_i32 = arith.constant 0 : i32
    %0 = arith.cmpi eq, %arg2, %c0_i32 : i32
    %1 = arith.extui %0 : i1 to i32
    %c0_i32_0 = arith.constant 0 : i32
    %2 = arith.cmpi ne, %1, %c0_i32_0 : i32
    scf.if %2 {
      %c0_8 = arith.constant 0 : index
      %c0_9 = arith.constant 0 : index
      %9 = vector.load %arg5[%c0_8, %c0_9] : memref<1x128xf32, #tpu.memory_space<vmem>>, vector<1x128xf32>
      %10 = vector.shape_cast %9 : vector<1x128xf32> to vector<1x128xf32>
      %11 = vector.broadcast %10 : vector<1x128xf32> to vector<8x128xf32>
      %c0_10 = arith.constant 0 : index
      %c0_11 = arith.constant 0 : index
      %12 = vector.load %arg6[%c0_10, %c0_11] : memref<8x128xf32, #tpu.memory_space<vmem>>, vector<8x128xf32>
      tpu.vector_store %arg6[%c0_10, %c0_11], %11 {strides = array<i32>} : memref<8x128xf32, #tpu.memory_space<vmem>>, vector<8x128xf32>,
    } else {
    }
    %c0 = arith.constant 0 : index
    %c0_1 = arith.constant 0 : index
    %3 = vector.load %arg6[%c0, %c0_1] : memref<8x128xf32, #tpu.memory_space<vmem>>, vector<8x128xf32>
    %c0_2 = arith.constant 0 : index
    %c0_3 = arith.constant 0 : index
    %4 = vector.load %arg3[%c0_2, %c0_3] : memref<8x128xbf16, #tpu.memory_space<vmem>>, vector<8x128xbf16>
    %c0_4 = arith.constant 0 : index
    %c0_5 = arith.constant 0 : index
    %5 = vector.load %arg4[%c0_4, %c0_5] : memref<128x128xbf16, #tpu.memory_space<vmem>>, vector<128x128xbf16>
    %cst = arith.constant dense<0.000000e+00> : vector<8x128xf32>
    %6 = tpu.matmul %4, %5, %cst {dimension_numbers = #tpu.dot_dimension_numbers<[1], [0], [0], [1], [0, 0, 1, 1], [], []>} : vector<8x128xbf16>, vector<128x128xbf16>, vector<8x128xf32> -> vector<8x128xf32>
    %7 = arith.addf %3, %6 : vector<8x128xf32>
    %c0_6 = arith.constant 0 : index
    %c0_7 = arith.constant 0 : index
    %8 = vector.load %arg6[%c0_6, %c0_7] : memref<8x128xf32, #tpu.memory_space<vmem>>, vector<8x128xf32>
    tpu.vector_store %arg6[%c0_6, %c0_7], %7 {strides = array<i32>} : memref<8x128xf32, #tpu.memory_space<vmem>>, vector<8x128xf32>,
    return
  }
  func.func @transform_0(%arg0: i32, %arg1: i32, %arg2: i32) -> (i32, i32) {
    %c0_i32 = arith.constant 0 : i32
    return %arg0, %arg2 : i32, i32
  }
  func.func @transform_1(%arg0: i32, %arg1: i32, %arg2: i32) -> (i32, i32) {
    %c0_i32 = arith.constant 0 : i32
    return %arg2, %arg1 : i32, i32
  }
  func.func @transform_2(%arg0: i32, %arg1: i32, %arg2: i32) -> (i32, i32) {
    %c0_i32 = arith.constant 0 : i32
    %c0_i32_0 = arith.constant 0 : i32
    return %c0_i32, %arg1 : i32, i32
  }
  func.func @transform_3(%arg0: i32, %arg1: i32, %arg2: i32) -> (i32, i32) {
    %c0_i32 = arith.constant 0 : i32
    return %arg0, %arg1 : i32, i32
  }
}

</mosaic_0001>

<bundles_post_ra>
// kernel: tpu_custom_call.1
= control target key start
LH: loop header
LB: loop body
LE: loop exit
PB: predicated region body
PF: predicated region fallthrough
CT: control target
= control target key end

     0   :  { %8 = vsyncpa [#allocation3], 0  ;;  %s376_s0 = inlined_call_operand.hbm [shape: bf16[8,128], index: 0, kind: input, shape index: {}]   ;;  %s377_s1 = inlined_call_operand.hbm [shape: bf16[128,128], index: 1, kind: input, shape index: {}]   ;;  %s378_s2 = inlined_call_operand.vmem [shape: f32[1,128], index: 2, kind: input, shape index: {}]   ;;  %s379_s3 = inlined_call_operand.hbm [shape: f32[8,128], index: 3, kind: output, shape index: {}]  }
   0x1   :  { %9 = vsyncpa [#allocation6], 0 }
   0x2   :  { %10 = vsyncpa [#allocation4], 0  ;;  %s303_s12 = smov [#allocation2]   ;;  %s304_s14 = smov [#allocation5]  }
   0x3   :  { %s17_s13 = sshll.u32 %s303_s12, 4  ;;  %s26_s15 = sshll.u32 %s304_s14, 4  ;;  %s18_s13 = int_to_ptr.vmem [resolvable:$true] %s17_s13  ;;  %s330_s15 = int_to_ptr.vmem [resolvable:$true] %s26_s15 }
   0x4   :  { %s231_s18 = scalar_lea.hbm %s376_s0, 64 }
   0x5   :  { %p232_p0 = scmp.ne.s32.totalorder %s376_s0, %s231_s18  ;;  %p235_p1 = scmp.lt.u32.totalorder %s231_s18, %s376_s0 }
   0x7   :  { %p237_p2 = pnand %p235_p1, %p232_p0 }
   0x9   :  { %240 = shalt.err (!%p237_p2)
}
   0xa   :  { %s241_s23 = scalar_lea.vmem %s18_s13, 64  ;;  %p246_p4 = scmp.lt.s32.totalorder %s18_s13, %s18_s13 }
   0xb   :  { %p242_p3 = scmp.ne.s32.totalorder %s18_s13, %s241_s23  ;;  %p247_p5 = scmp.lt.s32.totalorder %s241_s23, %s241_s23 }
   0xd   :  { %p248_p6 = por %p247_p5, %p246_p4 }
   0xf   :  { %p249_p7 = pnand %p248_p6, %p242_p3 }
  0x11   :  { %252 = shalt.err (!%p249_p7)
}
  0x12   :  { %20 = dma.hbm_to_vmem [thread:$0]  %s376_s0, 64, %s18_s13, [#allocation3]  }
  0x13   :  { %s253_s28 = scalar_lea.hbm %s377_s1, 1024 }
  0x14   :  { %p254_p8 = scmp.ne.s32.totalorder %s377_s1, %s253_s28  ;;  %p257_p9 = scmp.lt.u32.totalorder %s253_s28, %s377_s1 }
  0x16   :  { %p259_p10 = pnand %p257_p9, %p254_p8 }
  0x18   :  { %262 = shalt.err (!%p259_p10)
}
  0x19   :  { %s263_s6 = scalar_lea.vmem %s330_s15, 1024  ;;  %p268_p12 = scmp.lt.s32.totalorder %s330_s15, %s330_s15 }
  0x1a   :  { %p264_p11 = scmp.ne.s32.totalorder %s330_s15, %s263_s6  ;;  %p269_p13 = scmp.lt.s32.totalorder %s263_s6, %s263_s6 }
  0x1c   :  { %p270_p0 = por %p269_p13, %p268_p12 }
  0x1e   :  { %p271_p1 = pnand %p270_p0, %p264_p11 }
  0x20   :  { %274 = shalt.err (!%p271_p1)
}
  0x21   :  { %s305_s0 = smov 64   ;;  %s306_s7 = smov 4  }
  0x22   :  { %32 = dma.hbm_to_vmem [thread:$0]  %s377_s1, 1024, %s330_s15, [#allocation6], %s305_s0, %s305_s0, %s306_s7  }
  0x23   :  { %297 = dma.done.wait [#allocation3], 64  }
  0x24   :  { %298 = vsyncadd [#allocation3], 4294967232 }
  0x25   :  { %299 = dma.done.wait [#allocation6], 1024  }
  0x26   :  { %300 = vsyncadd [#allocation6], 4294966272  ;;  %v307_v0 = vmov 0.0   ;;  %vm308_vm0 = vmmov 0   ;;  %v223_v1 = vld [vmem:[#allocation5] sm:$0xff]   ;;  %v224_v2 = vld [vmem:[#allocation5 + $0x8] sm:$0xff]  }
  0x27   :  { %196 = vmatprep.subr.bf16.mxu0 %v307_v0  ;;  %212 = vmatprep.mubr.msk.bf16.mxu0 %vm308_vm0, %v307_v0  ;;  %v225_v3 = vld [vmem:[#allocation5 + $0x10] sm:$0xff]   ;;  %v226_v4 = vld [vmem:[#allocation5 + $0x18] sm:$0xff]   ;;  %v227_v5 = vld [vmem:[#allocation5 + $0x20] sm:$0xff]   ;;  %s309_s11 = smov [#allocation7]  }
  0x28   :  { %197 = vmatpush3.bf16.msra.mxu0 %v223_v1  ;;  %v228_v6 = vld [vmem:[#allocation5 + $0x28] sm:$0xff]   ;;  %v229_v7 = vld [vmem:[#allocation5 + $0x30] sm:$0xff]   ;;  %v230_v8 = vld [vmem:[#allocation5 + $0x38] sm:$0xff]   ;;  %s168_s12 = sshll.u32 %s309_s11, 4  ;;  %s169_s12 = int_to_ptr.vmem [resolvable:$true] %s168_s12 }
  0x29   :  { %198 = vmatprep.subr.bf16.mxu0 %v307_v0  ;;  %v55_v9 = vld [vmem:[#allocation2] sm:$0xf]  ;;  %s275_s13 = scalar_lea.vmem %s169_s12, 128  ;;  %p280_p3 = scmp.lt.s32.totalorder %s169_s12, %s169_s12 }
  0x2a   :  { %v178_v10 = vld [vmem:[%s378_s2] ss:$0 sm:$0xff]  ;;  %p276_p2 = scmp.ne.s32.totalorder %s169_s12, %s275_s13  ;;  %p281_p4 = scmp.lt.s32.totalorder %s275_s13, %s275_s13 }
  0x2c   :  { %199 = vmatpush3.bf16.msra.mxu0 %v224_v2  ;;  %p282_p5 = por %p281_p4, %p280_p3 }
  0x2d   :  { %200 = vmatprep.subr.bf16.mxu0 %v307_v0 }
  0x2e   :  { %p283_p6 = pnand %p282_p5, %p276_p2 }
  0x30   :  { %201 = vmatpush3.bf16.msra.mxu0 %v225_v3 }
  0x31   :  { %202 = vmatprep.subr.bf16.mxu0 %v307_v0 }
  0x34   :  { %203 = vmatpush3.bf16.msra.mxu0 %v226_v4 }
  0x35   :  { %204 = vmatprep.subr.bf16.mxu0 %v307_v0 }
  0x38   :  { %205 = vmatpush3.bf16.msra.mxu0 %v227_v5 }
  0x39   :  { %206 = vmatprep.subr.bf16.mxu0 %v307_v0 }
  0x3c   :  { %207 = vmatpush3.bf16.msra.mxu0 %v228_v6 }
  0x3d   :  { %208 = vmatprep.subr.bf16.mxu0 %v307_v0 }
  0x40   :  { %209 = vmatpush3.bf16.msra.mxu0 %v229_v7 }
  0x41   :  { %210 = vmatprep.subr.bf16.mxu0 %v307_v0 }
  0x44   :  { %211 = vmatpush3.bf16.msra.mxu0 %v230_v8 }
  0x47   :  { %213 = vmatmul.mubr.bf16.vlgmr.msra.gmra.mrb[0].mxu0 %v55_v9 }
 0x11a   :  { %v154_v11 = vpop.f32.mrb[0].mxu0 }
 0x11b   :  { %v160_v12 = vadd.f32 %v178_v10, %v154_v11  ;;  %v214_v13 = vpop.f32.mrb[1].mxu0 }
 0x11c   :  { %v157_v14 = vpop.f32.mrb[2].mxu0 }
 0x11d   :  { %161 = vst [vmem:[#allocation7] sm:$0xff] %v160_v12  ;;  %v215_v15 = vpop.f32.mrb[3].mxu0 }
 0x11e   :  { %286 = shalt.err (!%p283_p6)
}
 0x11f   :  { %s287_s2 = scalar_lea.hbm %s379_s3, 128 }
 0x120   :  { %p288_p7 = scmp.ne.s32.totalorder %s379_s3, %s287_s2  ;;  %p291_p8 = scmp.lt.u32.totalorder %s287_s2, %s379_s3 }
 0x122   :  { %p293_p9 = pnand %p291_p8, %p288_p7 }
 0x124   :  { %296 = shalt.err (!%p293_p9)
}
 0x125   :  { %171 = dma.vmem_to_hbm [thread:$0]  %s169_s12, 128, %s379_s3, [#allocation4]  }
 0x126   :  { %301 = dma.done.wait [#allocation4], 128  }
 0x127   :  { %302 = vsyncadd [#allocation4], 4294967168 }
 0x128   :  { %175 = vsyncpa [#allocation3], 1 }
 0x129   :  { %176 = vsyncpa [#allocation6], 1 }
 0x12a   :  { %177 = vsyncpa [#allocation4], 1 }

</bundles_post_ra>
